<compile_context>
chip_gen: v7x
topology: tpu7x:2x2x1
jax: 0.10.0
libtpu: 0.0.40
codegen_flags: <defaults>
</compile_context>

<pallas_src>
import functools

import jax
import jax.numpy as jnp
from jax.experimental import pallas as pl
from jax.experimental.pallas import tpu as pltpu


_CHUNK_BYTES = 64 << 20   # target ~64 MiB per DMA chunk for large copies
_MAX_CHUNKS = 8           # 4-8 outstanding DMAs hide per-descriptor latency


def _resolve_size(size, total):
    """Resolve a single -1 dim and validate the shape, like torch.view."""
    size = tuple(int(s) for s in size)
    neg = [i for i, s in enumerate(size) if s == -1]
    if len(neg) > 1:
        raise ValueError("only one dimension can be inferred (-1)")
    if neg:
        known = 1
        for s in size:
            if s != -1:
                known *= s
        if known == 0 or total % known != 0:
            raise ValueError(f"shape {size} is invalid for input of size {total}")
        size = tuple(total // known if s == -1 else s for s in size)
    prod = 1
    for s in size:
        prod *= s
    if prod != total:
        raise ValueError(f"shape {size} is invalid for input of size {total}")
    return size


def _chunk_bounds(leading, num_chunks):
    """Split `leading` rows into near-equal (start, size) chunks (static ints)."""
    k = max(1, min(int(num_chunks), int(leading)))
    base, rem = divmod(int(leading), k)
    bounds = []
    start = 0
    for i in range(k):
        size = base + (1 if i < rem else 0)
        if size > 0:
            bounds.append((start, size))
        start += size
    return tuple(bounds)


def _make_chunked_copy_kernel(chunks):
    """chunks: tuple of (start, size) along dim 0; () means whole-buffer copy."""

    def kernel(x_hbm_ref, o_hbm_ref, sems):
        if not chunks:
            cp = pltpu.make_async_copy(x_hbm_ref, o_hbm_ref, sems.at[0])
            cp.start()
            cp.wait()
            return
        copies = [
            pltpu.make_async_copy(
                x_hbm_ref.at[pl.ds(start, size)],
                o_hbm_ref.at[pl.ds(start, size)],
                sems.at[i],
            )
            for i, (start, size) in enumerate(chunks)
        ]
        # Issue every DMA before waiting on any: multiple outstanding
        # transactions hide descriptor-issue latency and spread the copy
        # across DMA queues.
        for cp in copies:
            cp.start()
        for cp in copies:
            cp.wait()

    return kernel


def _auto_num_chunks(shape, itemsize):
    if len(shape) < 2 or shape[0] <= 1:
        return 1
    total = 1
    for s in shape:
        total *= int(s)
    nbytes = total * itemsize
    want = max(1, nbytes // _CHUNK_BYTES)
    return int(min(_MAX_CHUNKS, want, shape[0]))


@functools.lru_cache(maxsize=None)
def _materialized_view_fn(in_shape, dtype_name, out_shape, num_chunks):
    """Build (and cache) a jitted 'copy then metadata-reshape' callable."""
    dtype = jnp.dtype(dtype_name)
    total = 1
    for s in in_shape:
        total *= int(s)
    nbytes = total * dtype.itemsize

    # Only chunk along dim 0 of >=2-D arrays (minor dims stay whole so every
    # DMA slice is layout-friendly); otherwise one whole-buffer DMA.
    if len(in_shape) >= 2 and in_shape[0] > 1 and num_chunks > 1:
        chunks = _chunk_bounds(in_shape[0], num_chunks)
    else:
        chunks = ()
    n_sems = max(1, len(chunks))

    copy_call = pl.pallas_call(
        _make_chunked_copy_kernel(chunks),
        out_shape=jax.ShapeDtypeStruct(in_shape, dtype),
        # Both sides stay in HBM: no VMEM round trip (also sidesteps v7x's
        # smaller 64 MiB VMEM), works for any shape/dtype.
        in_specs=[pl.BlockSpec(memory_space=pl.ANY)],
        out_specs=pl.BlockSpec(memory_space=pl.ANY),
        scratch_shapes=[pltpu.SemaphoreType.DMA((n_sems,))],
        cost_estimate=pl.CostEstimate(
            flops=0, transcendentals=0, bytes_accessed=2 * nbytes),
    )

    def fn(x):
        out = copy_call(x)
        # Inside jit this reshape is metadata-only (bitcast) — no second copy.
        return out.reshape(out_shape)

    return jax.jit(fn)


def view(tensor, size, *, force_materialize=False, num_chunks=None):
    """JAX/Pallas equivalent of `tensor.view(size)` for contiguous tensors.

    Default path is metadata-only (zero HBM traffic), exactly like torch.view.
    Set force_materialize=True to produce a fresh buffer via a chunked
    HBM->HBM Pallas DMA copy.
    """
    total = int(tensor.size)
    out_shape = _resolve_size(size, total)

    if not force_materialize:
        # Aliasing view: reshape is metadata-only / a bitcast under jit.
        return tensor.reshape(out_shape)

    if num_chunks is None:
        num_chunks = _auto_num_chunks(tensor.shape, tensor.dtype.itemsize)
    fn = _materialized_view_fn(
        tuple(int(s) for s in tensor.shape),
        str(tensor.dtype),
        out_shape,
        int(num_chunks),
    )
    return fn(tensor)


class View:
    """Mirror of the PyTorch module: View(size)(x) == x.view(size)."""

    def __init__(self, size, force_materialize=False):
        self.size = size
        self.force_materialize = force_materialize

    def __call__(self, tensor):
        return view(tensor, self.size, force_materialize=self.force_materialize)


if __name__ == "__main__":
    key = jax.random.PRNGKey(0)
    # Small NCHW-like input, consistent with how View is used in the original
    # script (flattening conv features before a linear layer).
    x = jax.random.normal(key, (2, 4, 16, 16), dtype=jnp.float32)
    target_size = (2, 4 * 16 * 16)

    # 1) Default path: metadata-only view (zero-copy), semantics of torch.view.
    y = jax.block_until_ready(View(target_size)(x))
    assert y.shape == target_size and y.dtype == x.dtype
    assert bool(jnp.all(y == x.reshape(target_size)))

    # 2) Forced-materialize path: single-DMA Pallas copy + bitcast reshape.
    y_mat = jax.block_until_ready(view(x, target_size, force_materialize=True))
    assert y_mat.shape == target_size
    assert bool(jnp.all(y_mat == x.reshape(target_size)))

    # 3) Forced-materialize path with multiple outstanding DMA chunks.
    y_chunk = jax.block_until_ready(
        view(x, (-1,), force_materialize=True, num_chunks=2))
    assert y_chunk.shape == (2 * 4 * 16 * 16,)
    assert bool(jnp.all(y_chunk == x.reshape(-1)))

    # 4) -1 inference, like torch.view(-1, 256).
    y2 = jax.block_until_ready(View((-1, 256))(x))
    assert y2.shape == (8, 256)
    assert bool(jnp.all(y2 == x.reshape(8, 256)))

    # 5) Non-lane-multiple element count through the chunked DMA path.
    x3 = jax.random.normal(jax.random.PRNGKey(1), (3, 5, 7, 11), dtype=jnp.float32)
    y3 = jax.block_until_ready(
        view(x3, (-1,), force_materialize=True, num_chunks=3))
    assert y3.shape == (3 * 5 * 7 * 11,)
    assert bool(jnp.all(y3 == x3.reshape(-1)))

    # 6) Tiny tensor, default metadata-only path.
    x4 = jnp.arange(24, dtype=jnp.float32).reshape(2, 3, 4)
    y4 = jax.block_until_ready(View((4, 6))(x4))
    assert y4.shape == (4, 6)
    assert bool(jnp.all(y4 == x4.reshape(4, 6)))

    print("KERNEL_OK")
</pallas_src>

<mosaic_0001>
module attributes {stable_mosaic.version = 11 : i64} {
  func.func @kernel(%arg0: memref<2x4x16x16xf32, #tpu.memory_space<any>>, %arg1: memref<2x4x16x16xf32, #tpu.memory_space<any>>, %arg2: memref<1x!tpu.dma_semaphore, #tpu.memory_space<semaphore_mem>>) attributes {dimension_semantics = [], scalar_prefetch = 0 : i64, scratch_operands = 1 : i64, tpu.core_type = #tpu.core_type<tc>} {
    %c0_i32 = arith.constant 0 : i32
    %0 = tpu.memref_slice %arg2[%c0_i32] : memref<1x!tpu.dma_semaphore, #tpu.memory_space<semaphore_mem>> -> memref<1x!tpu.dma_semaphore, #tpu.memory_space<semaphore_mem>>
    %1 = tpu.memref_squeeze %0 : memref<1x!tpu.dma_semaphore, #tpu.memory_space<semaphore_mem>> -> memref<!tpu.dma_semaphore, #tpu.memory_space<semaphore_mem>>
    tpu.enqueue_dma source(%arg0 : memref<2x4x16x16xf32, #tpu.memory_space<any>>) target(%arg1 : memref<2x4x16x16xf32, #tpu.memory_space<any>>) target_semaphore(%1 : memref<!tpu.dma_semaphore, #tpu.memory_space<semaphore_mem>>)
    %c0_i32_0 = arith.constant 0 : i32
    %2 = tpu.memref_slice %arg2[%c0_i32_0] : memref<1x!tpu.dma_semaphore, #tpu.memory_space<semaphore_mem>> -> memref<1x!tpu.dma_semaphore, #tpu.memory_space<semaphore_mem>>
    %3 = tpu.memref_squeeze %2 : memref<1x!tpu.dma_semaphore, #tpu.memory_space<semaphore_mem>> -> memref<!tpu.dma_semaphore, #tpu.memory_space<semaphore_mem>>
    tpu.wait_dma2 semaphore(%3 : memref<!tpu.dma_semaphore, #tpu.memory_space<semaphore_mem>>) src(%arg0 : memref<2x4x16x16xf32, #tpu.memory_space<any>>) dst(%arg1 : memref<2x4x16x16xf32, #tpu.memory_space<any>>)
    return
  }
}

</mosaic_0001>

<bundles_post_ra>
// kernel: fn.1
= control target key start
LH: loop header
LB: loop body
LE: loop exit
PB: predicated region body
PF: predicated region fallthrough
CT: control target
= control target key end

     0   :  { %s78_s0 = inlined_call_operand.hbm [shape: f32[2,4,16,16], index: 0, kind: input, shape index: {}]   ;;  %s79_s1 = inlined_call_operand.vmem [shape: f32[2,4,16,16], index: 1, kind: output, shape index: {}]  }
   0x1   :  { %s13_s8 = sshll.u32 %s79_s1, 4  ;;  %s29_s11 = scalar_lea.hbm %s78_s0, 2048  ;;  %s14_s8 = int_to_ptr.vmem [resolvable:$true] %s13_s8 }
   0x2   :  { %p30_p0 = scmp.ne.s32.totalorder %s78_s0, %s29_s11  ;;  %p33_p1 = scmp.lt.u32.totalorder %s29_s11, %s78_s0 }
   0x4   :  { %p35_p2 = pnand %p33_p1, %p30_p0 }
   0x6   :  { %38 = shalt.err (!%p35_p2)  }
   0x7   :  { %s39_s16 = scalar_lea.vmem %s14_s8, 2048  ;;  %p44_p4 = scmp.lt.s32.totalorder %s14_s8, %s14_s8 }
   0x8   :  { %p40_p3 = scmp.ne.s32.totalorder %s14_s8, %s39_s16  ;;  %p45_p5 = scmp.lt.s32.totalorder %s39_s16, %s39_s16 }
   0xa   :  { %p46_p6 = por %p45_p5, %p44_p4 }
   0xc   :  { %p47_p7 = pnand %p46_p6, %p40_p3 }
   0xe   :  { %50 = shalt.err (!%p47_p7)  }
   0xf   :  { %16 = dma.hbm_to_vmem [thread:$0]  %s78_s0, 2048, %s14_s8, [#allocation2] }
  0x10   :  { %51 = dma.done.wait [#allocation2], 2048 }
  0x11   :  { %52 = vsyncadd [#allocation2], 4294965248 }
  0x12   :  { %22 = vsyncmov [#allocation2] }
  0x15   :  { %s23_s18 = vpop.sfrf %22 }
  0x16   :  { %p28_p8 = scmp.ne.s32.totalorder %s23_s18, 0 }
  0x18   :  { %27 = shalt.err (%p28_p8)  }

</bundles_post_ra>
